<compile_context>
chip_gen: v5e
topology: v5e:2x2
jax: 0.10.0
libtpu: 0.0.40
codegen_flags: <defaults>
</compile_context>

<pallas_src>
import jax
import jax.numpy as jnp
from jax.experimental import pallas as pl
from jax.experimental.pallas import tpu as pltpu


def dmi_fused_kernel(x_ref, w_ref, b_ref, out_ref):
    x = x_ref[...]                                                    # [TB, input_dim]

    # Single fused linear: x @ W_fused + b_fused
    pre = jnp.dot(x, w_ref[...], preferred_element_type=jnp.float32) + b_ref[...]

    # F.normalize(pre, p=2, dim=1): denom = max(||row||_2, 1e-12)
    #   == pre * rsqrt(max(||row||_2^2, 1e-24))   (sqrt is monotone)
    sq = jnp.sum(pre * pre, axis=1, keepdims=True)
    inv_norm = jax.lax.rsqrt(jnp.maximum(sq, 1e-24))
    out_ref[...] = (pre * inv_norm).astype(out_ref.dtype)


def dmi_forward(x, params):
    wd, bd, wl, bl, wp, bp = params
    B, input_dim = x.shape
    output_dim = wd.shape[1]
    one_dim = wp.shape[1]
    # The PyTorch module adds pred (one_dim) to down_embedding (output_dim);
    # that only type-checks when they match. Fail loudly otherwise.
    assert output_dim == one_dim, (
        f"DMI requires output_dim == one_dim (got {output_dim} vs {one_dim})")

    # Algebraic fusion of the whole (eval-mode) linear path — exact:
    #   final_pre_norm = x @ (Wd + Wl @ Wp) + (bd + bl @ Wp + bp)
    w_fused = wd + wl @ wp                       # [input_dim, one_dim]
    b_fused = bd + bl @ wp + bp                  # [1, one_dim]

    # Batch tile: full batch if small; otherwise 512-row tiles (divisible by 8,
    # far under even v7x's 64 MiB VMEM at these feature dims).
    TB = B if B <= 512 else 512
    grid = (pl.cdiv(B, TB),)

    # TODO(synk): one_dim=32 last dim lowers to masked partial stores; a lane-dense
    #             (128-padded) output slab would help once batch is very large.
    return pl.pallas_call(
        dmi_fused_kernel,
        out_shape=jax.ShapeDtypeStruct((B, one_dim), jnp.float32),
        grid_spec=pltpu.PrefetchScalarGridSpec(
            num_scalar_prefetch=0,
            grid=grid,
            in_specs=[
                pl.BlockSpec((TB, input_dim), lambda i: (i, 0)),       # x tile
                pl.BlockSpec((input_dim, one_dim), lambda i: (0, 0)),  # fused W (resident)
                pl.BlockSpec((1, one_dim), lambda i: (0, 0)),          # fused bias (resident)
            ],
            out_specs=pl.BlockSpec((TB, one_dim), lambda i: (i, 0)),
        ),
        compiler_params=pltpu.CompilerParams(
            dimension_semantics=("parallel",)),
    )(x, w_fused, b_fused)


def dmi_reference(x, params):
    """Pure-JAX reference mirroring the PyTorch eval forward (unfused)."""
    wd, bd, wl, bl, wp, bp = params
    down = x @ wd + bd
    input_embedding = x @ wl + bl
    pred = input_embedding @ wp + bp
    final = pred + down
    norm = jnp.sqrt(jnp.sum(final * final, axis=1, keepdims=True))
    return final / jnp.maximum(norm, 1e-12)


def make_params(key, input_dim, one_dim, output_dim, num_layer):
    ks = jax.random.split(key, 6)
    scale_in = 1.0 / jnp.sqrt(input_dim)
    scale_cat = 1.0 / jnp.sqrt(one_dim * num_layer)
    # downsample: Linear(input_dim, output_dim)
    wd = jax.random.uniform(ks[0], (input_dim, output_dim), jnp.float32, -scale_in, scale_in)
    bd = jax.random.uniform(ks[1], (1, output_dim), jnp.float32, -scale_in, scale_in)
    # num_layer x Linear(input_dim, one_dim), stacked along the output dim
    wl = jax.random.uniform(ks[2], (input_dim, one_dim * num_layer), jnp.float32, -scale_in, scale_in)
    bl = jax.random.uniform(ks[3], (1, one_dim * num_layer), jnp.float32, -scale_in, scale_in)
    # pred_layer: Linear(one_dim*num_layer, one_dim)
    wp = jax.random.uniform(ks[4], (one_dim * num_layer, one_dim), jnp.float32, -scale_cat, scale_cat)
    bp = jax.random.uniform(ks[5], (1, one_dim), jnp.float32, -scale_cat, scale_cat)
    return wd, bd, wl, bl, wp, bp


if __name__ == "__main__":
    # cfg: input_dim=32, one_dim=32, output_dim=32 (must equal one_dim so pred+down adds),
    #      num_layer=4, fusion='late_fusion', temperature unused on the eval path.
    B, input_dim, one_dim, output_dim, num_layer = 8, 32, 32, 32, 4

    key = jax.random.PRNGKey(0)
    k_x, k_p = jax.random.split(key)
    x = jax.random.normal(k_x, (B, input_dim), jnp.float32)
    params = make_params(k_p, input_dim, one_dim, output_dim, num_layer)

    out = jax.block_until_ready(dmi_forward(x, params))
    ref = jax.block_until_ready(dmi_reference(x, params))

    assert out.shape == (B, one_dim), out.shape
    assert jnp.allclose(out, ref, atol=1e-5, rtol=1e-5), float(jnp.max(jnp.abs(out - ref)))

    # Also exercise the batch-tiled path (grid > 1, uneven last tile).
    B2 = 1030
    x2 = jax.random.normal(jax.random.PRNGKey(1), (B2, input_dim), jnp.float32)
    out2 = jax.block_until_ready(dmi_forward(x2, params))
    ref2 = jax.block_until_ready(dmi_reference(x2, params))
    assert out2.shape == (B2, one_dim), out2.shape
    assert jnp.allclose(out2, ref2, atol=1e-5, rtol=1e-5), float(jnp.max(jnp.abs(out2 - ref2)))

    print("KERNEL_OK")
</pallas_src>

<mosaic_0001>
module attributes {stable_mosaic.version = 11 : i64} {
  func.func @dmi_fused_kernel(%arg0: i32, %arg1: memref<8x32xf32, #tpu.memory_space<vmem>>, %arg2: memref<32x32xf32, #tpu.memory_space<vmem>>, %arg3: memref<1x32xf32, #tpu.memory_space<vmem>>, %arg4: memref<8x32xf32, #tpu.memory_space<vmem>>) attributes {dimension_semantics = [#tpu.dimension_semantics<parallel>], iteration_bounds = array<i64: 1>, scalar_prefetch = 0 : i64, scratch_operands = 0 : i64, tpu.core_type = #tpu.core_type<tc>, window_params = [{transform_indices = @transform_0, window_bounds = array<i64: 8, 32>}, {pipeline_mode = #tpu.pipeline_mode<synchronous>, transform_indices = @transform_1, window_bounds = array<i64: 32, 32>}, {pipeline_mode = #tpu.pipeline_mode<synchronous>, transform_indices = @transform_2, window_bounds = array<i64: 1, 32>}, {transform_indices = @transform_3, window_bounds = array<i64: 8, 32>}]} {
    %c0 = arith.constant 0 : index
    %c0_0 = arith.constant 0 : index
    %0 = vector.load %arg1[%c0, %c0_0] : memref<8x32xf32, #tpu.memory_space<vmem>>, vector<8x32xf32>
    %c0_1 = arith.constant 0 : index
    %c0_2 = arith.constant 0 : index
    %1 = vector.load %arg2[%c0_1, %c0_2] : memref<32x32xf32, #tpu.memory_space<vmem>>, vector<32x32xf32>
    %cst = arith.constant dense<0.000000e+00> : vector<8x32xf32>
    %2 = tpu.matmul %0, %1, %cst {dimension_numbers = #tpu.dot_dimension_numbers<[1], [0], [0], [1], [0, 0, 1, 1], [], []>} : vector<8x32xf32>, vector<32x32xf32>, vector<8x32xf32> -> vector<8x32xf32>
    %c0_3 = arith.constant 0 : index
    %c0_4 = arith.constant 0 : index
    %3 = vector.load %arg3[%c0_3, %c0_4] : memref<1x32xf32, #tpu.memory_space<vmem>>, vector<1x32xf32>
    %4 = vector.broadcast %3 : vector<1x32xf32> to vector<8x32xf32>
    %5 = arith.addf %2, %4 : vector<8x32xf32>
    %6 = arith.mulf %5, %5 : vector<8x32xf32>
    %cst_5 = arith.constant dense<0.000000e+00> : vector<8xf32>
    %7 = vector.multi_reduction <add>, %6, %cst_5 [1] : vector<8x32xf32> to vector<8xf32>
    %8 = vector.shape_cast %7 : vector<8xf32> to vector<8x1xf32>
    %cst_6 = arith.constant 1.000000e-24 : f32
    %9 = vector.broadcast %cst_6 : f32 to vector<8x1xf32>
    %10 = arith.maximumf %8, %9 : vector<8x1xf32>
    %11 = math.rsqrt %10 : vector<8x1xf32>
    %12 = vector.broadcast %11 : vector<8x1xf32> to vector<8x32xf32>
    %13 = arith.mulf %5, %12 : vector<8x32xf32>
    %c0_7 = arith.constant 0 : index
    %c0_8 = arith.constant 0 : index
    %14 = vector.load %arg4[%c0_7, %c0_8] : memref<8x32xf32, #tpu.memory_space<vmem>>, vector<8x32xf32>
    tpu.vector_store %arg4[%c0_7, %c0_8], %13 {strides = array<i32>} : memref<8x32xf32, #tpu.memory_space<vmem>>, vector<8x32xf32>,
    return
  }
  func.func @transform_0(%arg0: i32) -> (i32, i32) {
    %c0_i32 = arith.constant 0 : i32
    %c0_i32_0 = arith.constant 0 : i32
    return %arg0, %c0_i32 : i32, i32
  }
  func.func @transform_1(%arg0: i32) -> (i32, i32) {
    %c0_i32 = arith.constant 0 : i32
    %c0_i32_0 = arith.constant 0 : i32
    %c0_i32_1 = arith.constant 0 : i32
    return %c0_i32, %c0_i32_0 : i32, i32
  }
  func.func @transform_2(%arg0: i32) -> (i32, i32) {
    %c0_i32 = arith.constant 0 : i32
    %c0_i32_0 = arith.constant 0 : i32
    %c0_i32_1 = arith.constant 0 : i32
    return %c0_i32, %c0_i32_0 : i32, i32
  }
  func.func @transform_3(%arg0: i32) -> (i32, i32) {
    %c0_i32 = arith.constant 0 : i32
    %c0_i32_0 = arith.constant 0 : i32
    return %arg0, %c0_i32 : i32, i32
  }
}

</mosaic_0001>

<bundles_post_ra>
// kernel: tpu_custom_call.1
= control target key start
LH: loop header
LB: loop body
LE: loop exit
PB: predicated region body
PF: predicated region fallthrough
CT: control target
= control target key end

     0   :  { %8 = vsyncpa [#allocation3], 0  ;;  %s240_s0 = inlined_call_operand.hbm [shape: f32[8,32], index: 0, kind: input, shape index: {}]   ;;  %s241_s1 = inlined_call_operand.hbm [shape: f32[32,32], index: 1, kind: input, shape index: {}]   ;;  %s242_s2 = inlined_call_operand.vmem [shape: f32[1,32], index: 2, kind: input, shape index: {}]   ;;  %s243_s3 = inlined_call_operand.hbm [shape: f32[8,32], index: 3, kind: output, shape index: {}]  }
   0x1   :  { %9 = vsyncpa [#allocation6], 0 }
   0x2   :  { %10 = vsyncpa [#allocation4], 0  ;;  %s16_s14 = sshll.u32 %s240_s0, 4  ;;  %s200_s15 = smov [#allocation2]   ;;  %s17_s14 = int_to_ptr.hbm [resolvable:$true] %s16_s14 }
   0x3   :  { %s18_s16 = sshll.u32 %s200_s15, 4  ;;  %s26_s19 = sshll.u32 %s241_s1, 4  ;;  %s19_s16 = int_to_ptr.vmem [resolvable:$true] %s18_s16  ;;  %s27_s19 = int_to_ptr.hbm [resolvable:$true] %s26_s19 }
   0x4   :  { %21 = dma.hbm_to_vmem [thread:$0]  %s17_s14, 128, %s19_s16, [#allocation3]  }
   0x5   :  { %s201_s20 = smov [#allocation5]   ;;  %s202_s22 = smov 128  }
   0x6   :  { %s28_s21 = sshll.u32 %s201_s20, 4  ;;  %s203_s23 = smov 8   ;;  %s29_s21 = int_to_ptr.vmem [resolvable:$true] %s28_s21 }
   0x7   :  { %34 = dma.hbm_to_vmem [thread:$0]  %s27_s19, 512, %s29_s21, [#allocation6], %s202_s22, %s202_s22, %s203_s23  }
   0x8   :  { %194 = dma.done.wait [#allocation3], 128  }
   0x9   :  { %195 = vsyncadd [#allocation3], 4294967168 }
   0xa   :  { %196 = dma.done.wait [#allocation6], 512  }
   0xb   :  { %197 = vsyncadd [#allocation6], 4294966784  ;;  %v49_v0 = vld [vmem:[#allocation5 + $0x18] sm:$0xff]  ;;  %v48_v1 = vld [vmem:[#allocation5 + $0x10] sm:$0xff]  ;;  %vm54_vm0 = vcmask 261120   ;;  %s204_s24 = smov [#allocation7]  }
   0xc   :  { %70 = vmatpush.msra.mxu0 %v49_v0  ;;  %v47_v2 = vld [vmem:[#allocation5 + $0x8] sm:$0xff]  ;;  %v46_v3 = vld [vmem:[#allocation5] sm:$0xff]  ;;  %v45_v4 = vld [vmem:[#allocation2] sm:$0xff]  ;;  %s100_s25 = sshll.u32 %s204_s24, 4  ;;  %s102_s27 = sshll.u32 %s243_s3, 4  ;;  %s101_s25 = int_to_ptr.vmem [resolvable:$true] %s100_s25  ;;  %s103_s27 = int_to_ptr.hbm [resolvable:$true] %s102_s27 }
   0xd   :  { %v119_v5 = vld [vmem:[%s242_s2] ss:$0 sm:$0xff] }
   0xe   :  { %71 = vmatpush.msra.mxu0 %v48_v1 }
  0x10   :  { %72 = vmatpush.msra.mxu0 %v47_v2 }
  0x12   :  { %73 = vmatpush.msra.mxu0 %v46_v3 }
  0x13   :  { %113 = vmatmul.msk.f32.vlgmr.msra.gmra.mxu0 %vm54_vm0, %v45_v4 }
  0x90   :  { %v75_v6 = vpop.f32.mrf.mxu0 }
  0x91   :  { %v76_v7 = vadd.f32 %v119_v5, %v75_v6 }
  0x93   :  { %v78_v8 = vmul.f32 %v76_v7, %v76_v7 }
  0x95   :  { %v79_v9 = vsel %vm54_vm0, %v78_v8, 0.0 }
  0x96   :  { %80 = vadd.xlane.f32.xlu0 %v79_v9 }
 0x109   :  { %v81_v10 = vpop.xlane.xlu0 %80 }
 0x10a   :  { %v82_v11 = vmax.f32 %v81_v10, 1e-24 }
 0x10c   :  { %120 = vrsqrt.f32 %v82_v11  ;;  %vm89_vm2 = vweird.f32 %v82_v11 }
 0x112   :  { %v121_v12 = vpop.eup %120 }
 0x113   :  { %v84_v13 = vmul.f32 %v121_v12, %v82_v11  ;;  %vm90_vm1 = vweird.f32 %v121_v12 }
 0x114   :  { %vm91_vm3 = vmor %vm89_vm2, %vm90_vm1 }
 0x115   :  { %v85_v14 = vmul.f32 %v121_v12, %v84_v13 }
 0x117   :  { %v86_v15 = vmul.f32 0.5, %v85_v14 }
 0x119   :  { %v87_v16 = vsub.f32 1.5, %v86_v15 }
 0x11b   :  { %v88_v17 = vmul.f32 %v121_v12, %v87_v16 }
 0x11d   :  { %v92_v18 = vsel %vm91_vm3, %v121_v12, %v88_v17 }
 0x11e   :  { %v93_v19 = vmul.f32 %v92_v18, %v76_v7 }
 0x120   :  { %94 = vst.msk [vmem:[#allocation7] sm:$0xff] %vm54_vm0, %v93_v19 }
 0x121   :  { %105 = dma.vmem_to_hbm [thread:$0]  %s101_s25, 128, %s103_s27, [#allocation4]  }
 0x122   :  { %198 = dma.done.wait [#allocation4], 128  }
 0x123   :  { %199 = vsyncadd [#allocation4], 4294967168 }
 0x124   :  { %110 = vsyncpa [#allocation3], 1 }
 0x125   :  { %111 = vsyncpa [#allocation6], 1 }
 0x126   :  { %112 = vsyncpa [#allocation4], 1 }

</bundles_post_ra>
